<compile_context>
chip_gen: v5e
topology: v5e:2x2
jax: 0.10.0
libtpu: 0.0.40
codegen_flags: <defaults>
</compile_context>

<pallas_src>
import jax
import jax.numpy as jnp
from jax.experimental import pallas as pl
from jax.experimental.pallas import tpu as pltpu


def actor_kernel(x_ref, w1_ref, b1_ref, w2_ref, b2_ref, o_ref):
    # fc1 + ReLU: bf16 MXU matmul with f32 accumulation; elementwise in f32.
    x = x_ref[...].astype(jnp.bfloat16)
    w1 = w1_ref[...].astype(jnp.bfloat16)
    h = jnp.dot(x, w1, preferred_element_type=jnp.float32)
    h = jnp.maximum(h + b1_ref[...].astype(jnp.float32), 0.0)

    # fc2 (logits stay f32).
    w2 = w2_ref[...].astype(jnp.bfloat16)
    logits = jnp.dot(h.astype(jnp.bfloat16), w2, preferred_element_type=jnp.float32)
    logits = logits + b2_ref[...].astype(jnp.float32)

    # Numerically stable softmax over the (unpadded) last dim.  Exact divide so each
    # row sums to 1 to f32 precision.
    m = jnp.max(logits, axis=-1, keepdims=True)
    e = jnp.exp(logits - m)
    denom = jnp.sum(e, axis=-1, keepdims=True)
    o_ref[...] = (e / denom).astype(o_ref.dtype)


def actor_forward(x, w1, b1, w2, b2, *, block_b=1024):
    B, in_dim = x.shape
    in_dim_w, hid = w1.shape
    hid_w, out_dim = w2.shape
    assert in_dim == in_dim_w and hid == hid_w

    out_shape = jax.ShapeDtypeStruct((B, out_dim), jnp.float32)
    cost = pl.CostEstimate(
        flops=2 * B * (in_dim * hid + hid * out_dim),
        transcendentals=B * out_dim,
        bytes_accessed=(
            x.size * x.dtype.itemsize
            + w1.size * w1.dtype.itemsize + b1.size * b1.dtype.itemsize
            + w2.size * w2.dtype.itemsize + b2.size * b2.dtype.itemsize
            + B * out_dim * 4
        ),
    )

    if B <= block_b:
        # Genuinely small batch: single shot, no grid, everything VMEM-resident.
        vmem = pl.BlockSpec(memory_space=pltpu.MemorySpace.VMEM)
        return pl.pallas_call(
            actor_kernel,
            out_shape=out_shape,
            in_specs=[vmem] * 5,
            out_specs=vmem,
            cost_estimate=cost,
        )(x, w1, b1, w2, b2)

    # Large batch: tile only the batch axis.  pl.cdiv handles B % block_b != 0 via a
    # masked boundary tile (rows are independent, so padded rows never affect valid
    # ones and are never stored).  Weights/biases stay VMEM-resident across grid
    # steps; the batch axis is "parallel" so v7x shards it across both TensorCores.
    grid = (pl.cdiv(B, block_b),)
    return pl.pallas_call(
        actor_kernel,
        out_shape=out_shape,
        grid=grid,
        in_specs=[
            pl.BlockSpec((block_b, in_dim), lambda i: (i, 0)),
            pl.BlockSpec((in_dim, hid), lambda i: (0, 0)),
            pl.BlockSpec((1, hid), lambda i: (0, 0)),
            pl.BlockSpec((hid, out_dim), lambda i: (0, 0)),
            pl.BlockSpec((1, out_dim), lambda i: (0, 0)),
        ],
        out_specs=pl.BlockSpec((block_b, out_dim), lambda i: (i, 0)),
        compiler_params=pltpu.CompilerParams(
            dimension_semantics=("parallel",),
        ),
        cost_estimate=cost,
    )(x, w1, b1, w2, b2)


def reference_forward(x, w1, b1, w2, b2):
    h = jnp.maximum(x @ w1 + b1, 0.0)
    return jax.nn.softmax(h @ w2 + b2, axis=-1)


if __name__ == "__main__":
    # Small shapes consistent with the module: batch=8, input=32, hidden=64, output=16
    B, input_dim, hidden_dim, output_dim = 8, 32, 64, 16

    key = jax.random.PRNGKey(0)
    k_x, k_w1, k_b1, k_w2, k_b2, k_xb = jax.random.split(key, 6)

    # Deterministic parameter init (mimicking nn.Linear uniform scale ~ 1/sqrt(fan_in))
    x = jax.random.normal(k_x, (B, input_dim), dtype=jnp.float32)
    s1 = 1.0 / jnp.sqrt(jnp.float32(input_dim))
    s2 = 1.0 / jnp.sqrt(jnp.float32(hidden_dim))
    w1 = jax.random.uniform(k_w1, (input_dim, hidden_dim), jnp.float32, -s1, s1)
    b1 = jax.random.uniform(k_b1, (1, hidden_dim), jnp.float32, -s1, s1)
    w2 = jax.random.uniform(k_w2, (hidden_dim, output_dim), jnp.float32, -s2, s2)
    b2 = jax.random.uniform(k_b2, (1, output_dim), jnp.float32, -s2, s2)

    # Init-time (hoisted) cast of weights to bf16 for the MXU; biases stay f32.
    w1_k = w1.astype(jnp.bfloat16)
    w2_k = w2.astype(jnp.bfloat16)

    ref_fn = jax.jit(reference_forward)

    # ---- Small-batch (no-grid, fully VMEM-resident) path ----
    out = jax.block_until_ready(actor_forward(x, w1_k, b1, w2_k, b2))
    ref = ref_fn(x, w1, b1, w2, b2)
    assert out.shape == (B, output_dim)
    # bf16 matmul operands -> ~1e-3 abs error on probabilities; tolerance accordingly.
    assert jnp.allclose(out, ref, atol=1e-2, rtol=1e-2), "small-batch mismatch vs reference"
    assert jnp.allclose(jnp.sum(out, axis=-1), 1.0, atol=1e-5)

    # ---- Large-batch (batch-tiled, weights VMEM-resident) path.  B not divisible by
    #      block_b exercises the masked boundary tile; grid length 4 (>= 2, even) lets
    #      v7x use both TensorCores. ----
    B_big, block_b = 1000, 256
    x_big = jax.random.normal(k_xb, (B_big, input_dim), dtype=jnp.float32)
    out_big = jax.block_until_ready(
        actor_forward(x_big, w1_k, b1, w2_k, b2, block_b=block_b)
    )
    ref_big = ref_fn(x_big, w1, b1, w2, b2)
    assert out_big.shape == (B_big, output_dim)
    assert jnp.allclose(out_big, ref_big, atol=1e-2, rtol=1e-2), "batched mismatch vs reference"
    assert jnp.allclose(jnp.sum(out_big, axis=-1), 1.0, atol=1e-5)

    print("KERNEL_OK")
</pallas_src>

<mosaic_0001>
module attributes {stable_mosaic.version = 11 : i64} {
  func.func @actor_kernel(%arg0: memref<8x32xf32, #tpu.memory_space<vmem>>, %arg1: memref<32x64xbf16, #tpu.memory_space<vmem>>, %arg2: memref<1x64xf32, #tpu.memory_space<vmem>>, %arg3: memref<64x16xbf16, #tpu.memory_space<vmem>>, %arg4: memref<1x16xf32, #tpu.memory_space<vmem>>, %arg5: memref<8x16xf32, #tpu.memory_space<vmem>>) attributes {dimension_semantics = [], scalar_prefetch = 0 : i64, scratch_operands = 0 : i64, tpu.core_type = #tpu.core_type<tc>} {
    %c0 = arith.constant 0 : index
    %c0_0 = arith.constant 0 : index
    %0 = vector.load %arg0[%c0, %c0_0] : memref<8x32xf32, #tpu.memory_space<vmem>>, vector<8x32xf32>
    %1 = arith.truncf %0 : vector<8x32xf32> to vector<8x32xbf16>
    %c0_1 = arith.constant 0 : index
    %c0_2 = arith.constant 0 : index
    %2 = vector.load %arg1[%c0_1, %c0_2] : memref<32x64xbf16, #tpu.memory_space<vmem>>, vector<32x64xbf16>
    %cst = arith.constant dense<0.000000e+00> : vector<8x64xf32>
    %3 = tpu.matmul %1, %2, %cst {dimension_numbers = #tpu.dot_dimension_numbers<[1], [0], [0], [1], [0, 0, 1, 1], [], []>} : vector<8x32xbf16>, vector<32x64xbf16>, vector<8x64xf32> -> vector<8x64xf32>
    %c0_3 = arith.constant 0 : index
    %c0_4 = arith.constant 0 : index
    %4 = vector.load %arg2[%c0_3, %c0_4] : memref<1x64xf32, #tpu.memory_space<vmem>>, vector<1x64xf32>
    %5 = vector.broadcast %4 : vector<1x64xf32> to vector<8x64xf32>
    %6 = arith.addf %3, %5 : vector<8x64xf32>
    %cst_5 = arith.constant 0.000000e+00 : f32
    %7 = vector.broadcast %cst_5 : f32 to vector<8x64xf32>
    %8 = arith.maximumf %6, %7 : vector<8x64xf32>
    %c0_6 = arith.constant 0 : index
    %c0_7 = arith.constant 0 : index
    %9 = vector.load %arg3[%c0_6, %c0_7] : memref<64x16xbf16, #tpu.memory_space<vmem>>, vector<64x16xbf16>
    %10 = arith.truncf %8 : vector<8x64xf32> to vector<8x64xbf16>
    %cst_8 = arith.constant dense<0.000000e+00> : vector<8x16xf32>
    %11 = tpu.matmul %10, %9, %cst_8 {dimension_numbers = #tpu.dot_dimension_numbers<[1], [0], [0], [1], [0, 0, 1, 1], [], []>} : vector<8x64xbf16>, vector<64x16xbf16>, vector<8x16xf32> -> vector<8x16xf32>
    %c0_9 = arith.constant 0 : index
    %c0_10 = arith.constant 0 : index
    %12 = vector.load %arg4[%c0_9, %c0_10] : memref<1x16xf32, #tpu.memory_space<vmem>>, vector<1x16xf32>
    %13 = vector.broadcast %12 : vector<1x16xf32> to vector<8x16xf32>
    %14 = arith.addf %11, %13 : vector<8x16xf32>
    %cst_11 = arith.constant dense<0xFF800000> : vector<8xf32>
    %15 = vector.multi_reduction <maximumf>, %14, %cst_11 [1] : vector<8x16xf32> to vector<8xf32>
    %16 = vector.shape_cast %15 : vector<8xf32> to vector<8x1xf32>
    %17 = vector.broadcast %16 : vector<8x1xf32> to vector<8x16xf32>
    %18 = arith.subf %14, %17 : vector<8x16xf32>
    %19 = math.exp %18 : vector<8x16xf32>
    %cst_12 = arith.constant dense<0.000000e+00> : vector<8xf32>
    %20 = vector.multi_reduction <add>, %19, %cst_12 [1] : vector<8x16xf32> to vector<8xf32>
    %21 = vector.shape_cast %20 : vector<8xf32> to vector<8x1xf32>
    %22 = vector.broadcast %21 : vector<8x1xf32> to vector<8x16xf32>
    %23 = arith.divf %19, %22 : vector<8x16xf32>
    %c0_13 = arith.constant 0 : index
    %c0_14 = arith.constant 0 : index
    %24 = vector.load %arg5[%c0_13, %c0_14] : memref<8x16xf32, #tpu.memory_space<vmem>>, vector<8x16xf32>
    tpu.vector_store %arg5[%c0_13, %c0_14], %23 {strides = array<i32>} : memref<8x16xf32, #tpu.memory_space<vmem>>, vector<8x16xf32>,
    return
  }
}

</mosaic_0001>

<bundles_post_ra>
// kernel: tpu_custom_call.1
= control target key start
LH: loop header
LB: loop body
LE: loop exit
PB: predicated region body
PF: predicated region fallthrough
CT: control target
= control target key end

     0   :  { %s287_s0 = inlined_call_operand.vmem [shape: f32[8,32], index: 0, kind: input, shape index: {}]   ;;  %s288_s1 = inlined_call_operand.vmem [shape: bf16[32,64], index: 1, kind: input, shape index: {}]   ;;  %s289_s2 = inlined_call_operand.vmem [shape: f32[1,64], index: 2, kind: input, shape index: {}]   ;;  %s290_s3 = inlined_call_operand.vmem [shape: bf16[64,16], index: 3, kind: input, shape index: {}]   ;;  %s291_s4 = inlined_call_operand.vmem [shape: f32[1,16], index: 4, kind: input, shape index: {}]   ;;  %s292_s5 = inlined_call_operand.hbm [shape: f32[8,16], index: 5, kind: output, shape index: {}]  }
   0x1   :  { %v185_v0 = vld [vmem:[%s288_s1 + $0x8] sm:$0xff]  ;;  %v184_v1 = vld [vmem:[%s288_s1] sm:$0xff]  ;;  %v189_v2 = vld [vmem:[%s290_s3 + $0x18] sm:$0xff] }
   0x2   :  { %54 = vmatpush.bf16.msra.mxu0 %v185_v0  ;;  %v22_v3 = vld [vmem:[%s287_s0] sm:$0xff] }
   0x3   :  { %10 = vsyncpa [#allocation3], 0  ;;  %107 = vmatpush.bf16.msra.mxu1 %v189_v2  ;;  %v188_v4 = vld [vmem:[%s290_s3 + $0x10] sm:$0xff]  ;;  %v23_v5 = vpack.c.bf16 %v22_v3, %v22_v3  ;;  %vm44_vm0 = vcmask 261120   ;;  %v187_v6 = vld [vmem:[%s290_s3 + $0x8] sm:$0xff]  ;;  %vm99_vm1 = vcmask 523264  }
   0x4   :  { %v186_v7 = vld [vmem:[%s290_s3] sm:$0xff]  ;;  %vm116_vm2 = vcmask 130048   ;;  %s149_s10 = sshll.u32 %s292_s5, 4  ;;  %s150_s10 = int_to_ptr.hbm [resolvable:$true] %s149_s10 }
   0x5   :  { %v191_v8 = vld [vmem:[%s289_s2] ss:$0 sm:$0xff]  ;;  %s223_s2 = smov [#allocation2]  }
   0x6   :  { %55 = vmatpush.bf16.msra.mxu0 %v184_v1  ;;  %v192_v14 = vld [vmem:[%s291_s4] ss:$0 sm:$0xff]  ;;  %s147_s3 = sshll.u32 %s223_s2, 4  ;;  %s148_s3 = int_to_ptr.vmem [resolvable:$true] %s147_s3 }
   0x7   :  { %108 = vmatpush.bf16.msra.mxu1 %v188_v4 }
   0x9   :  { %166 = vmatmul.msk.bf16.vlgmr.msra.gmra.mxu0 %vm44_vm0, %v23_v5 }
   0xb   :  { %109 = vmatpush.bf16.msra.mxu1 %v187_v6 }
   0xf   :  { %110 = vmatpush.bf16.msra.mxu1 %v186_v7 }
  0x86   :  { %v57_v9 = vpop.f32.mrf.mxu0 }
  0x87   :  { %v58_v10 = vadd.f32 %v191_v8, %v57_v9 }
  0x89   :  { %v61_v11 = vmax.f32 %v58_v10, 0.0 }
  0x8b   :  { %v70_v12 = vpack.c.bf16 %v61_v11, %v61_v11 }
  0x8d   :  { %183 = vmatmul.msk.bf16.vlgmr.msra.gmra.mxu1 %vm99_vm1, %v70_v12 }
  0x8e   :  { %v59_v13 = vpop.f32.mrf.mxu0 }
 0x10a   :  { %v112_v15 = vpop.f32.mrf.mxu1 }
 0x10b   :  { %v113_v16 = vadd.f32 %v192_v14, %v112_v15 }
 0x10d   :  { %v117_v17 = vsel %vm116_vm2, %v113_v16, -inf }
 0x10e   :  { %118 = vmax.xlane.f32.xlu0 %v117_v17 }
 0x112   :  { %v114_v18 = vpop.f32.mrf.mxu1 }
 0x181   :  { %v119_v19 = vpop.xlane.xlu0 %118 }
 0x182   :  { %v120_v20 = vsub.f32 %v113_v16, %v119_v19 }
 0x184   :  { %v121_v21 = vmul.f32 1.442695, %v120_v20 }
 0x186   :  { %193 = vpow2.f32 %v121_v21 }
 0x18c   :  { %v194_v22 = vpop.eup %193 }
 0x18d   :  { %v123_v23 = vsel %vm116_vm2, %v194_v22, 0.0 }
 0x18e   :  { %124 = vadd.xlane.f32.xlu0 %v123_v23 }
 0x201   :  { %v125_v24 = vpop.xlane.xlu0 %124 }
 0x202   :  { %195 = vrcp.f32 %v125_v24  ;;  %v137_v28 = vand.u32 2147483648, %v125_v24  ;;  %v135_v30 = vand.u32 2147483647, %v125_v24  ;;  %vm131_vm4 = vweird.f32 %v125_v24 }
 0x204   :  { %v138_v32 = vor.u32 1.1754944e-38, %v137_v28  ;;  %vm136_vm6 = vcmp.eq.f32.partialorder %v135_v30, 8.507059e+37 }
 0x208   :  { %v196_v25 = vpop.eup %195 }
 0x209   :  { %v127_v26 = vmul.f32 %v196_v25, %v125_v24  ;;  %vm132_vm3 = vweird.f32 %v196_v25 }
 0x20a   :  { %vm133_vm5 = vmor %vm131_vm4, %vm132_vm3 }
 0x20b   :  { %v128_v27 = vsub.f32 1.0, %v127_v26 }
 0x20d   :  { %v129_v29 = vmul.f32 %v196_v25, %v128_v27 }
 0x20f   :  { %v130_v31 = vadd.f32 %v196_v25, %v129_v29 }
 0x211   :  { %v134_v33 = vsel %vm133_vm5, %v196_v25, %v130_v31 }
 0x212   :  { %v139_v34 = vsel %vm136_vm6, %v138_v32, %v134_v33 }
 0x213   :  { %v140_v35 = vmul.f32 %v194_v22, %v139_v34 }
 0x215   :  { %141 = vst.msk [vmem:[#allocation2] sm:$0xff] %vm116_vm2, %v140_v35 }
 0x216   :  { %152 = dma.vmem_to_hbm [thread:$0]  %s148_s3, 128, %s150_s10, [#allocation3]  }
 0x217   :  { %221 = dma.done.wait [#allocation3], 128  }
 0x218   :  { %222 = vsyncadd [#allocation3], 4294967168 }
 0x219   :  { %157 = vsyncpa [#allocation3], 1 }

</bundles_post_ra>
